<compile_context>
chip_gen: v7x
topology: tpu7x:2x2x1
jax: 0.10.0
libtpu: 0.0.40
codegen_flags: <defaults>
</compile_context>

<pallas_src>
import jax
import jax.numpy as jnp
import numpy as np
from jax.experimental import pallas as pl
from jax.experimental.pallas import tpu as pltpu

_LANES = 384                 # 3 coords * 128 points per row (3 lane-dense vregs)
_BLK_ROWS = 1024             # up to 131072 points / 1.5 MiB (f32) per block
_TARGET_GRID = 4             # keep >= ~4 grid steps so both v7x TCs stay pipelined
_PALLAS_MIN_POINTS = 8192    # TODO(synk): re-derive crossover from a full xprof trace


def _round_up(x, m):
    return ((x + m - 1) // m) * m


def _se3_exp(xi):
    """se(3) tangent (6,) [tau, phi] -> (R (3,3), t (3,)). Plain-JAX glue."""
    xi = xi.astype(jnp.float32)
    tau, phi = xi[:3], xi[3:]
    theta2 = jnp.sum(phi * phi)
    theta = jnp.sqrt(theta2)
    small = theta < 1e-4
    safe = jnp.where(small, 1.0, theta)
    A = jnp.where(small, 1.0 - theta2 / 6.0, jnp.sin(safe) / safe)
    B = jnp.where(small, 0.5 - theta2 / 24.0, (1.0 - jnp.cos(safe)) / (safe * safe))
    C = jnp.where(small, 1.0 / 6.0 - theta2 / 120.0,
                  (safe - jnp.sin(safe)) / (safe * safe * safe))
    wx = jnp.array([[0.0, -1.0, 1.0],
                    [1.0, 0.0, -1.0],
                    [-1.0, 1.0, 0.0]], jnp.float32) * jnp.array(
        [[1.0, phi[2], phi[1]],
         [phi[2], 1.0, phi[0]],
         [phi[1], phi[0], 1.0]], jnp.float32)
    wx2 = wx @ wx
    I = jnp.eye(3, dtype=jnp.float32)
    R = I + A * wx + B * wx2
    V = I + B * wx + C * wx2
    t = V @ tau
    return R, t


def _lane_weights(R, t):
    """(6, 384) f32 per-lane weights [W_-2, W_-1, W_0, W_+1, W_+2, T]."""
    z = jnp.zeros((), jnp.float32)
    per_coord = jnp.stack([
        jnp.stack([z, z, R[2, 0]]),              # W_-2 : c==2 -> R[2,0]
        jnp.stack([z, R[1, 0], R[2, 1]]),        # W_-1
        jnp.stack([R[0, 0], R[1, 1], R[2, 2]]),  # W_0
        jnp.stack([R[0, 1], R[1, 2], z]),        # W_+1
        jnp.stack([R[0, 2], z, z]),              # W_+2 : c==0 -> R[0,2]
        t,                                       # T
    ])                                           # (6, 3)
    lane_c = jnp.arange(_LANES, dtype=jnp.int32) % 3
    onehot = (jnp.arange(3, dtype=jnp.int32)[:, None] == lane_c[None, :])
    return per_coord @ onehot.astype(jnp.float32)          # (6, 384)


def _se3_act_kernel(w_ref, x_ref, o_ref):
    """w_ref: VMEM (6, 384) f32 = [W_-2, W_-1, W_0, W_+1, W_+2, T]
       x_ref / o_ref: VMEM (blk, 384) native-dtype interleaved xyz points."""
    v = x_ref[...].astype(jnp.float32)     # upcast in-register (bf16/f16 inputs)
    w = w_ref[...]
    n = v.shape[-1]
    # out[l] = sum_d W_d[l] * v[l + d] + T[l];  v[l + d] == roll(v, -d)[l].
    # Wrap-around lanes are always paired with a zero weight, so the lane
    # rotation never mixes data between points (only NaN inputs could bleed
    # to a neighbouring point via 0 * NaN, which we accept).
    acc = w[2:3, :] * v + w[5:6, :]
    acc = acc + w[1:2, :] * pltpu.roll(v, 1, 1)        # d = -1
    acc = acc + w[0:1, :] * pltpu.roll(v, 2, 1)        # d = -2
    acc = acc + w[3:4, :] * pltpu.roll(v, n - 1, 1)    # d = +1
    acc = acc + w[4:5, :] * pltpu.roll(v, n - 2, 1)    # d = +2
    o_ref[...] = acc.astype(o_ref.dtype)


def se3_act(pose, x, *, force_pallas=False):
    """pose: (1, 6) se(3) tangent parameter; x: (..., 3) points -> (..., 3)."""
    R, t = _se3_exp(pose.reshape(-1)[:6])

    orig_shape = x.shape
    orig_dtype = x.dtype
    P = int(np.prod(orig_shape)) // 3

    # Small-P fallback: fused XLA elementwise beats any kernel launch cost.
    if P < _PALLAS_MIN_POINTS and not force_pallas:
        y = x.reshape(-1, 3).astype(jnp.float32) @ R.T + t
        return y.reshape(orig_shape).astype(orig_dtype)

    native = orig_dtype in (jnp.float32, jnp.bfloat16, jnp.float16)
    flat = x.reshape(-1)                              # free: natural interleaved order
    if not native:
        flat = flat.astype(jnp.float32)               # TODO(synk): exotic dtypes pay one cast pass

    n = flat.shape[0]
    n_pad = _round_up(n, _LANES)
    if n_pad != n:
        # Only non-multiple-of-128 point counts pay this pad copy.
        flat = jnp.pad(flat, (0, n_pad - n))
    nrows = n_pad // _LANES
    x2d = flat.reshape(nrows, _LANES)                 # free reshape, lane-dense rows

    blk = min(_BLK_ROWS, _round_up(pl.cdiv(nrows, _TARGET_GRID), 32))
    if blk > nrows:
        blk = nrows                                   # block == full extent is always legal
    grid = (pl.cdiv(nrows, blk),)

    weights = _lane_weights(R, t)
    itemsize = x2d.dtype.itemsize

    out2d = pl.pallas_call(
        _se3_act_kernel,
        out_shape=jax.ShapeDtypeStruct((nrows, _LANES), x2d.dtype),
        grid_spec=pltpu.PrefetchScalarGridSpec(
            num_scalar_prefetch=0,
            grid=grid,
            in_specs=[
                pl.BlockSpec((6, _LANES), lambda i: (0, 0)),       # resident weights
                pl.BlockSpec((blk, _LANES), lambda i: (i, 0)),
            ],
            out_specs=pl.BlockSpec((blk, _LANES), lambda i: (i, 0)),
        ),
        compiler_params=pltpu.CompilerParams(
            dimension_semantics=("parallel",)),
        cost_estimate=pl.CostEstimate(
            flops=10 * nrows * _LANES,
            transcendentals=0,
            bytes_accessed=2 * nrows * _LANES * itemsize + 6 * _LANES * 4),
    )(weights, x2d)

    out = out2d.reshape(-1)
    if n_pad != n:
        out = out[:n]
    out = out.reshape(orig_shape)
    return out if out.dtype == orig_dtype else out.astype(orig_dtype)


def _reference(pose, x):
    R, t = _se3_exp(pose.reshape(-1)[:6])
    return (x.astype(jnp.float32) @ R.T + t).astype(x.dtype)


if __name__ == "__main__":
    key = jax.random.PRNGKey(0)

    # Module __init__: pose = SE3.Identity(1).log() -> zeros of shape (1, 6).
    pose_id = jnp.zeros((1, 6), jnp.float32)

    # Small point cloud consistent with forward(x): (B, N, 3) -> P = 128 (no pad).
    x_small = jax.random.normal(key, (2, 64, 3), dtype=jnp.float32)

    y = jax.block_until_ready(se3_act(pose_id, x_small, force_pallas=True))
    np.testing.assert_allclose(np.asarray(y), np.asarray(_reference(pose_id, x_small)),
                               rtol=1e-5, atol=1e-5)
    # Identity pose -> act is a no-op.
    np.testing.assert_allclose(np.asarray(y), np.asarray(x_small), rtol=1e-5, atol=1e-5)

    # Non-identity pose, multi-block grid, ragged tail (P = 10000 -> padded rows).
    pose2 = jnp.array([[0.1, -0.2, 0.3, 0.4, -0.5, 0.6]], jnp.float32)
    x_big = jax.random.normal(jax.random.split(key)[0], (2, 5000, 3), dtype=jnp.float32)
    y2 = jax.block_until_ready(se3_act(pose2, x_big, force_pallas=True))
    np.testing.assert_allclose(np.asarray(y2), np.asarray(_reference(pose2, x_big)),
                               rtol=1e-4, atol=1e-5)

    # Native bf16 path: points DMA'd as bf16, upcast in-register, stored as bf16.
    x_bf16 = x_big.astype(jnp.bfloat16)
    y3 = jax.block_until_ready(se3_act(pose2, x_bf16, force_pallas=True))
    np.testing.assert_allclose(np.asarray(y3, dtype=np.float32),
                               np.asarray(_reference(pose2, x_bf16), dtype=np.float32),
                               rtol=3e-2, atol=3e-2)

    # Default path (small-P plain-JAX fallback) matches too.
    y4 = jax.block_until_ready(se3_act(pose2, x_small))
    np.testing.assert_allclose(np.asarray(y4), np.asarray(_reference(pose2, x_small)),
                               rtol=1e-4, atol=1e-5)

    print("KERNEL_OK")
</pallas_src>

<mosaic_0001>
module attributes {stable_mosaic.version = 11 : i64} {
  func.func @_se3_act_kernel(%arg0: i32, %arg1: memref<6x384xf32, #tpu.memory_space<vmem>>, %arg2: memref<1x384xf32, #tpu.memory_space<vmem>>, %arg3: memref<1x384xf32, #tpu.memory_space<vmem>>) attributes {dimension_semantics = [#tpu.dimension_semantics<parallel>], iteration_bounds = array<i64: 1>, scalar_prefetch = 0 : i64, scratch_operands = 0 : i64, tpu.core_type = #tpu.core_type<tc>, window_params = [{pipeline_mode = #tpu.pipeline_mode<synchronous>, transform_indices = @transform_0, window_bounds = array<i64: 6, 384>}, {transform_indices = @transform_1, window_bounds = array<i64: 1, 384>}, {transform_indices = @transform_2, window_bounds = array<i64: 1, 384>}]} {
    %c0 = arith.constant 0 : index
    %c0_0 = arith.constant 0 : index
    %0 = vector.load %arg2[%c0, %c0_0] : memref<1x384xf32, #tpu.memory_space<vmem>>, vector<1x384xf32>
    %c0_1 = arith.constant 0 : index
    %c0_2 = arith.constant 0 : index
    %1 = vector.load %arg1[%c0_1, %c0_2] : memref<6x384xf32, #tpu.memory_space<vmem>>, vector<6x384xf32>
    %2 = vector.extract_strided_slice %1 {offsets = [2, 0], sizes = [1, 384], strides = [1, 1]} : vector<6x384xf32> to vector<1x384xf32>
    %3 = arith.mulf %2, %0 : vector<1x384xf32>
    %4 = vector.extract_strided_slice %1 {offsets = [5, 0], sizes = [1, 384], strides = [1, 1]} : vector<6x384xf32> to vector<1x384xf32>
    %5 = arith.addf %3, %4 : vector<1x384xf32>
    %6 = vector.extract_strided_slice %1 {offsets = [1, 0], sizes = [1, 384], strides = [1, 1]} : vector<6x384xf32> to vector<1x384xf32>
    %c1_i32 = arith.constant 1 : i32
    %7 = tpu.dynamic_rotate %0 by %c1_i32 dim 1 : vector<1x384xf32>, i32 -> vector<1x384xf32>
    %8 = arith.mulf %6, %7 : vector<1x384xf32>
    %9 = arith.addf %5, %8 : vector<1x384xf32>
    %10 = vector.extract_strided_slice %1 {offsets = [0, 0], sizes = [1, 384], strides = [1, 1]} : vector<6x384xf32> to vector<1x384xf32>
    %c2_i32 = arith.constant 2 : i32
    %11 = tpu.dynamic_rotate %0 by %c2_i32 dim 1 : vector<1x384xf32>, i32 -> vector<1x384xf32>
    %12 = arith.mulf %10, %11 : vector<1x384xf32>
    %13 = arith.addf %9, %12 : vector<1x384xf32>
    %14 = vector.extract_strided_slice %1 {offsets = [3, 0], sizes = [1, 384], strides = [1, 1]} : vector<6x384xf32> to vector<1x384xf32>
    %c383_i32 = arith.constant 383 : i32
    %15 = tpu.dynamic_rotate %0 by %c383_i32 dim 1 : vector<1x384xf32>, i32 -> vector<1x384xf32>
    %16 = arith.mulf %14, %15 : vector<1x384xf32>
    %17 = arith.addf %13, %16 : vector<1x384xf32>
    %18 = vector.extract_strided_slice %1 {offsets = [4, 0], sizes = [1, 384], strides = [1, 1]} : vector<6x384xf32> to vector<1x384xf32>
    %c382_i32 = arith.constant 382 : i32
    %19 = tpu.dynamic_rotate %0 by %c382_i32 dim 1 : vector<1x384xf32>, i32 -> vector<1x384xf32>
    %20 = arith.mulf %18, %19 : vector<1x384xf32>
    %21 = arith.addf %17, %20 : vector<1x384xf32>
    %c0_3 = arith.constant 0 : index
    %c0_4 = arith.constant 0 : index
    %22 = vector.load %arg3[%c0_3, %c0_4] : memref<1x384xf32, #tpu.memory_space<vmem>>, vector<1x384xf32>
    tpu.vector_store %arg3[%c0_3, %c0_4], %21 {strides = array<i32>} : memref<1x384xf32, #tpu.memory_space<vmem>>, vector<1x384xf32>,
    return
  }
  func.func @transform_0(%arg0: i32) -> (i32, i32) {
    %c0_i32 = arith.constant 0 : i32
    %c0_i32_0 = arith.constant 0 : i32
    %c0_i32_1 = arith.constant 0 : i32
    return %c0_i32, %c0_i32_0 : i32, i32
  }
  func.func @transform_1(%arg0: i32) -> (i32, i32) {
    %c0_i32 = arith.constant 0 : i32
    %c0_i32_0 = arith.constant 0 : i32
    return %arg0, %c0_i32 : i32, i32
  }
  func.func @transform_2(%arg0: i32) -> (i32, i32) {
    %c0_i32 = arith.constant 0 : i32
    %c0_i32_0 = arith.constant 0 : i32
    return %arg0, %c0_i32 : i32, i32
  }
}

</mosaic_0001>

<bundles_post_ra>
// kernel: tpu_custom_call.1
= control target key start
LH: loop header
LB: loop body
LE: loop exit
PB: predicated region body
PF: predicated region fallthrough
CT: control target
= control target key end

     0   :  { %7 = vsyncpa [#allocation3], 0  ;;  %s391_s0 = inlined_call_operand.hbm [shape: f32[6,384], index: 0, kind: input, shape index: {}]   ;;  %s392_s1 = inlined_call_operand.vmem [shape: f32[1,384], index: 1, kind: input, shape index: {}]   ;;  %s393_s2 = inlined_call_operand.hbm [shape: f32[1,384], index: 2, kind: output, shape index: {}]  }
   0x1   :  { %8 = vsyncpa [#allocation4], 0  ;;  %s291_s9 = smov [#allocation2]   ;;  %s243_s13 = scalar_lea.hbm %s391_s0, 384 }
   0x2   :  { %s15_s10 = sshll.u32 %s291_s9, 4  ;;  %p244_p0 = scmp.ne.s32.totalorder %s391_s0, %s243_s13  ;;  %s16_s10 = int_to_ptr.vmem [resolvable:$true] %s15_s10 }
   0x3   :  { %p247_p1 = scmp.lt.u32.totalorder %s243_s13, %s391_s0 }
   0x5   :  { %p249_p2 = pnand %p247_p1, %p244_p0 }
   0x7   :  { %252 = shalt.err (!%p249_p2)
}
   0x8   :  { %s253_s18 = scalar_lea.vmem %s16_s10, 384  ;;  %p258_p4 = scmp.lt.s32.totalorder %s16_s10, %s16_s10 }
   0x9   :  { %p254_p3 = scmp.ne.s32.totalorder %s16_s10, %s253_s18  ;;  %p259_p5 = scmp.lt.s32.totalorder %s253_s18, %s253_s18 }
   0xb   :  { %p260_p6 = por %p259_p5, %p258_p4 }
   0xd   :  { %p261_p7 = pnand %p260_p6, %p254_p3 }
   0xf   :  { %264 = shalt.err (!%p261_p7)
}
  0x10   :  { %18 = dma.hbm_to_vmem [thread:$0]  %s391_s0, 384, %s16_s10, [#allocation3]  }
  0x11   :  { %287 = dma.done.wait [#allocation3], 384  }
  0x12   :  { %288 = vsyncadd [#allocation3], 4294966912  ;;  %v29_v0 = vlaneseq  ;;  %v24_v5 = vld [vmem:[%s392_s1] sm:$0x7]  ;;  %s292_s23 = smov 1   ;;  %s293_s0 = smov 2  }
  0x13   :  { %s294_s24 = smov 127   ;;  %s295_s25 = smov 126   ;;  %v337_v10 = vld [vmem:[#allocation2] sm:$0x3f]  ;;  %v342_v15 = vld [vmem:[#allocation2 + $0x8] sm:$0x3f] }
  0x14   :  { %v326_v1 = vshrl.u32 %v29_v0, 7  ;;  %v335_v9 = vand.u32 127, %v29_v0  ;;  %v50_v12 = vrot.slane %v337_v10, 3  ;;  %v346_v17 = vld [vmem:[#allocation2 + $0x10] sm:$0x3f]  ;;  %v51_v20 = vrot.slane %v342_v15, 3 }
  0x15   :  { %v52_v25 = vrot.slane %v346_v17, 3  ;;  %s297_s1 = smov [#allocation5]   ;;  %vm218_vm4 = vcmp.lt.s32.totalorder %v29_v0, 384 }
  0x16   :  { %v39_v2 = vsub.s32 2, %v326_v1  ;;  %v31_v3 = vsub.s32 0, %v326_v1  ;;  %v35_v4 = vsub.s32 1, %v326_v1  ;;  %vm67_vm0 = vcmp.lt.s32.totalorder %v335_v9, 1  ;;  %s227_s26 = sshll.u32 %s297_s1, 4  ;;  %s228_s26 = int_to_ptr.vmem [resolvable:$true] %s227_s26 }
  0x17   :  { %vm101_vm1 = vcmp.lt.s32.totalorder %v335_v9, 2  ;;  %vm126_vm2 = vcmp.lt.s32.totalorder %v335_v9, 127  ;;  %vm160_vm3 = vcmp.lt.s32.totalorder %v335_v9, 126  ;;  %s265_s27 = scalar_lea.vmem %s228_s26, 48  ;;  %s269_s28 = scalar_lea.vmem %s228_s26, 64 }
  0x18   :  { %v40_v6 = vrot.slane %v24_v5, %v39_v2  ;;  %v32_v7 = vrot.slane %v24_v5, %v31_v3  ;;  %v36_v8 = vrot.slane %v24_v5, %v35_v4  ;;  %v296_v2 = vmov 1966171168   ;;  %p266_p8 = scmp.ne.s32.totalorder %s228_s26, %s265_s27  ;;  %p270_p9 = scmp.lt.s32.totalorder %s228_s26, %s228_s26 }
  0x19   :  { %v193_v3 = vunpack.c.l.s4 %v296_v2  ;;  %p271_p10 = scmp.lt.s32.totalorder %s269_s28, %s265_s27 }
  0x1a   :  { %63 = vrot.lane.b32.xlu1 %v40_v6, %s292_s23  ;;  %59 = vrot.lane.b32.xlu0 %v32_v7, %s292_s23  ;;  %v44_v14 = vmul.f32 %v32_v7, %v337_v10  ;;  %v45_v19 = vmul.f32 %v36_v8, %v342_v15  ;;  %v46_v24 = vmul.f32 %v40_v6, %v346_v17 }
  0x1b   :  { %p272_p11 = por %p271_p10, %p270_p9 }
  0x1c   :  { %v56_v21 = vadd.f32 %v50_v12, %v44_v14  ;;  %v57_v32 = vadd.f32 %v51_v20, %v45_v19  ;;  %v58_v34 = vadd.f32 %v52_v25, %v46_v24  ;;  %v194_v14 = vunpack.c.0.s8 %v193_v3 }
  0x1d   :  { %p273_p12 = pnand %p272_p11, %p266_p8 }
  0x1e   :  { %95 = vrot.lane.b32.xlu1 %v32_v7, %s293_s0  ;;  %61 = vrot.lane.b32.xlu0 %v36_v8, %s292_s23 }
  0x22   :  { %99 = vrot.lane.b32.xlu1 %v40_v6, %s293_s0  ;;  %97 = vrot.lane.b32.xlu0 %v36_v8, %s293_s0 }
  0x26   :  { %122 = vrot.lane.b32.xlu1 %v36_v8, %s294_s24  ;;  %120 = vrot.lane.b32.xlu0 %v32_v7, %s294_s24 }
  0x2a   :  { %154 = vrot.lane.b32.xlu1 %v32_v7, %s295_s25  ;;  %124 = vrot.lane.b32.xlu0 %v40_v6, %s294_s24 }
  0x2e   :  { %158 = vrot.lane.b32.xlu1 %v40_v6, %s295_s25  ;;  %156 = vrot.lane.b32.xlu0 %v36_v8, %s295_s25 }
  0x8c   :  { %v64_v11 = vpop.permute.xlu1 %63  ;;  %v60_v13 = vpop.permute.xlu0 %59 }
  0x8d   :  { %v70_v16 = vsel %vm67_vm0, %v64_v11, %v60_v13 }
  0x8e   :  { %v74_v18 = vrot.slane %v70_v16, 7 }
  0x90   :  { %v80_v22 = vmul.f32 %v74_v18, %v337_v10  ;;  %v96_v23 = vpop.permute.xlu1 %95  ;;  %v62_v26 = vpop.permute.xlu0 %61 }
  0x91   :  { %v68_v27 = vsel %vm67_vm0, %v62_v26, %v64_v11  ;;  %v69_v28 = vsel %vm67_vm0, %v60_v13, %v62_v26 }
  0x92   :  { %v86_v29 = vrot.slane %v80_v22, 7  ;;  %v75_v30 = vrot.slane %v69_v28, 7  ;;  %v76_v31 = vrot.slane %v68_v27, 7 }
  0x94   :  { %v92_v33 = vadd.f32 %v86_v29, %v56_v21  ;;  %v81_v35 = vmul.f32 %v75_v30, %v342_v15  ;;  %v82_v36 = vmul.f32 %v76_v31, %v346_v17  ;;  %v100_v37 = vpop.permute.xlu1 %99  ;;  %v98_v38 = vpop.permute.xlu0 %97  ;;  %v197_v29 = vsub.s32 %v194_v14, %v326_v1 }
  0x95   :  { %v104_v39 = vsel %vm101_vm1, %v100_v37, %v96_v23  ;;  %v102_v40 = vsel %vm101_vm1, %v98_v38, %v100_v37  ;;  %v103_v41 = vsel %vm101_vm1, %v96_v23, %v98_v38 }
  0x96   :  { %v87_v42 = vrot.slane %v81_v35, 7  ;;  %v88_v43 = vrot.slane %v82_v36, 7  ;;  %v105_v44 = vmul.f32 %v104_v39, %v337_v10  ;;  %v106_v45 = vmul.f32 %v103_v41, %v342_v15 }
  0x97   :  { %v107_v46 = vmul.f32 %v102_v40, %v346_v17 }
  0x98   :  { %v93_v47 = vadd.f32 %v87_v42, %v57_v32  ;;  %v94_v48 = vadd.f32 %v88_v43, %v58_v34  ;;  %v111_v49 = vrot.slane %v105_v44, 6  ;;  %v112_v50 = vrot.slane %v106_v45, 6  ;;  %v123_v51 = vpop.permute.xlu1 %122  ;;  %v121_v52 = vpop.permute.xlu0 %120 }
  0x99   :  { %v113_v53 = vrot.slane %v107_v46, 6  ;;  %v128_v54 = vsel %vm126_vm2, %v121_v52, %v123_v51 }
  0x9a   :  { %v117_v55 = vadd.f32 %v111_v49, %v92_v33  ;;  %v118_v56 = vadd.f32 %v112_v50, %v93_v47  ;;  %v133_v57 = vrot.slane %v128_v54, 5 }
  0x9b   :  { %v119_v58 = vadd.f32 %v113_v53, %v94_v48 }
  0x9c   :  { %v139_v59 = vmul.f32 %v133_v57, %v337_v10  ;;  %v155_v60 = vpop.permute.xlu1 %154  ;;  %v125_v61 = vpop.permute.xlu0 %124 }
  0x9d   :  { %v127_v62 = vsel %vm126_vm2, %v123_v51, %v125_v61  ;;  %v129_v63 = vsel %vm126_vm2, %v125_v61, %v121_v52 }
  0x9e   :  { %v145_v4 = vrot.slane %v139_v59, 1  ;;  %v134_v5 = vrot.slane %v127_v62, 5  ;;  %v135_v6 = vrot.slane %v129_v63, 5 }
  0xa0   :  { %v151_v7 = vadd.f32 %v145_v4, %v117_v55  ;;  %v140_v8 = vmul.f32 %v134_v5, %v342_v15  ;;  %v141_v11 = vmul.f32 %v135_v6, %v346_v17  ;;  %v159_v12 = vpop.permute.xlu1 %158  ;;  %v157_v13 = vpop.permute.xlu0 %156 }
  0xa1   :  { %v163_v16 = vsel %vm160_vm3, %v159_v12, %v155_v60  ;;  %v161_v18 = vsel %vm160_vm3, %v157_v13, %v159_v12  ;;  %v162_v19 = vsel %vm160_vm3, %v155_v60, %v157_v13 }
  0xa2   :  { %v146_v20 = vrot.slane %v140_v8, 1  ;;  %v147_v21 = vrot.slane %v141_v11, 1  ;;  %v169_v22 = vrot.slane %v163_v16, 4  ;;  %v167_v23 = vrot.slane %v162_v19, 4 }
  0xa3   :  { %v168_v24 = vrot.slane %v161_v18, 4 }
  0xa4   :  { %v152_v25 = vadd.f32 %v146_v20, %v118_v56  ;;  %v153_v26 = vadd.f32 %v147_v21, %v119_v58  ;;  %v175_v9 = vmul.f32 %v169_v22, %v346_v17  ;;  %v173_v27 = vmul.f32 %v167_v23, %v337_v10 }
  0xa5   :  { %v174_v28 = vmul.f32 %v168_v24, %v342_v15 }
  0xa6   :  { %v181_v30 = vrot.slane %v175_v9, 2  ;;  %v179_v31 = vrot.slane %v173_v27, 2 }
  0xa7   :  { %v180_v32 = vrot.slane %v174_v28, 2 }
  0xa8   :  { %v187_v33 = vadd.f32 %v181_v30, %v153_v26  ;;  %v185_v34 = vadd.f32 %v179_v31, %v151_v7 }
  0xa9   :  { %v186_v35 = vadd.f32 %v180_v32, %v152_v25 }
  0xaa   :  { %v205_v36 = vrot.slane %v187_v33, %v197_v29 }
  0xab   :  { %v191_v37 = vcombine.low %v185_v34, %v186_v35 }
  0xad   :  { %v198_v38 = vrot.slane %v191_v37, %v197_v29 }
  0xaf   :  { %v206_v39 = vcombine.low %v198_v38, %v205_v36 }
  0xb1   :  { %v213_v40 = vrot.slane %v206_v39, %v197_v29 }
  0xb3   :  { %v214_v10 = vcombine.high %v213_v40, %v213_v40 }
  0xb5   :  { %220 = vst.msk [vmem:[#allocation5] sm:$0x7] %vm218_vm4, %v214_v10 }
  0xb6   :  { %276 = shalt.err (!%p273_p12)
}
  0xb7   :  { %s277_s3 = scalar_lea.hbm %s393_s2, 48 }
  0xb8   :  { %p278_p13 = scmp.ne.s32.totalorder %s393_s2, %s277_s3  ;;  %p281_p0 = scmp.lt.u32.totalorder %s277_s3, %s393_s2 }
  0xba   :  { %p283_p1 = pnand %p281_p0, %p278_p13 }
  0xbc   :  { %286 = shalt.err (!%p283_p1)
}
  0xbd   :  { %230 = dma.vmem_to_hbm [thread:$0]  %s228_s26, 48, %s393_s2, [#allocation4]  }
  0xbe   :  { %289 = dma.done.wait [#allocation4], 48  }
  0xbf   :  { %290 = vsyncadd [#allocation4], 4294967248 }
  0xc0   :  { %234 = vsyncpa [#allocation3], 1 }
  0xc1   :  { %235 = vsyncpa [#allocation4], 1 }

</bundles_post_ra>
